<compile_context>
chip_gen: v5e
topology: v5e:2x2
jax: 0.10.0
libtpu: 0.0.40
codegen_flags: <defaults>
</compile_context>

<pallas_src>
import jax
import jax.numpy as jnp
from jax.experimental import pallas as pl
from jax.experimental.pallas import tpu as pltpu


# ----------------------------------------------------------------------------
# Pallas kernel: full bottleneck block for ONE batch element.
# Activations are kept in (H, W*channels) "row" layout throughout.
# ----------------------------------------------------------------------------
def bottleneck_kernel(x_ref,            # (1, H, W*C)        bf16
                      w1_ref, b1_ref,   # (W*C, W*P) bf16, (1, W*P) f32
                      w2_ref, b2_ref,   # (3, W*P, W*P) bf16, (1, W*P) f32
                      w3_ref, b3_ref,   # (W*P, W*C) bf16, (1, W*C) f32
                      o_ref,            # (1, H, W*C)        bf16
                      yp_ref):          # VMEM (H+2, W*P)    bf16  (vert-padded y1)
    _, H, _ = x_ref.shape
    WP = yp_ref.shape[1]

    x2d = x_ref[0]                                                 # (H, W*C) bf16

    # ---- conv1 (1x1, block-diag weights) + folded-BN bias + relu ------------
    y1 = jnp.dot(x2d, w1_ref[...], preferred_element_type=jnp.float32)
    y1 = jnp.maximum(y1 + b1_ref[...], 0.0).astype(yp_ref.dtype)   # (H, W*P)

    # ---- stage y1 with a 1-row zero border top/bottom (vertical 3x3 taps) ---
    # Horizontal padding is already baked into the banded w2 matrices, so the
    # scratch only needs two zero border rows (re-zeroed each step, cheap).
    yp_ref[0:1, :] = jnp.zeros((1, WP), yp_ref.dtype)
    yp_ref[H + 1:H + 2, :] = jnp.zeros((1, WP), yp_ref.dtype)
    yp_ref[1:H + 1, :] = y1

    # ---- conv2 (3x3, stride 1, pad 1) as 3 banded matmuls + bias + relu -----
    acc = jnp.dot(yp_ref[0:H, :], w2_ref[0], preferred_element_type=jnp.float32)
    acc += jnp.dot(yp_ref[1:H + 1, :], w2_ref[1], preferred_element_type=jnp.float32)
    acc += jnp.dot(yp_ref[2:H + 2, :], w2_ref[2], preferred_element_type=jnp.float32)
    y2 = jnp.maximum(acc + b2_ref[...], 0.0).astype(x2d.dtype)     # (H, W*P)

    # ---- conv3 (1x1 -> 4P, block-diag) + bias + residual add + relu ---------
    y3 = jnp.dot(y2, w3_ref[...], preferred_element_type=jnp.float32) + b3_ref[...]
    out = jnp.maximum(y3 + x2d.astype(jnp.float32), 0.0)           # (H, W*C) f32
    o_ref[0] = out.astype(o_ref.dtype)


# ----------------------------------------------------------------------------
# NHWC wrapper: grid over batch; HBM-side reshape (N,H,W,C)<->(N,H,W*C) is a
# contiguous no-op reshape.
# ----------------------------------------------------------------------------
def bottleneck_forward_nhwc(x_nhwc, w1_bd, b1, w2_band, b2, w3_bd, b3):
    N, H, W, C = x_nhwc.shape
    WP = w1_bd.shape[1]
    x2d = x_nhwc.reshape(N, H, W * C)

    out = pl.pallas_call(
        bottleneck_kernel,
        out_shape=jax.ShapeDtypeStruct((N, H, W * C), x_nhwc.dtype),
        grid=(N,),
        in_specs=[
            pl.BlockSpec((1, H, W * C), lambda n: (n, 0, 0)),
            pl.BlockSpec(w1_bd.shape, lambda n: (0, 0)),
            pl.BlockSpec(b1.shape, lambda n: (0, 0)),
            pl.BlockSpec(w2_band.shape, lambda n: (0, 0, 0)),
            pl.BlockSpec(b2.shape, lambda n: (0, 0)),
            pl.BlockSpec(w3_bd.shape, lambda n: (0, 0)),
            pl.BlockSpec(b3.shape, lambda n: (0, 0)),
        ],
        out_specs=pl.BlockSpec((1, H, W * C), lambda n: (n, 0, 0)),
        scratch_shapes=[pltpu.VMEM((H + 2, WP), jnp.bfloat16)],
        compiler_params=pltpu.CompilerParams(
            dimension_semantics=("parallel",)),
    )(x2d, w1_bd, b1, w2_band, b2, w3_bd, b3)

    return out.reshape(N, H, W, C)


# Thin NCHW adapter for the PyTorch-style test.  In a full network the layout
# transpose is done once at the model boundary, not per bottleneck call.
def bottleneck_forward_nchw(x_nchw, w1_bd, b1, w2_band, b2, w3_bd, b3):
    x = jnp.transpose(x_nchw, (0, 2, 3, 1))                        # NCHW -> NHWC
    out = bottleneck_forward_nhwc(x, w1_bd, b1, w2_band, b2, w3_bd, b3)
    return jnp.transpose(out, (0, 3, 1, 2))                        # NHWC -> NCHW


# ----------------------------------------------------------------------------
# One-time parameter prep: fold eval-mode BN into conv weights, then fold the
# spatial structure into block-diag (1x1 convs) / banded (3x3 conv) matrices
# that operate directly on the lane-dense (H, W*channels) activation layout.
# ----------------------------------------------------------------------------
def fold_bn_into_weights(w1_t, bn1, w2_t, bn2, w3_t, bn3, W, eps=1e-5,
                         dtype=jnp.bfloat16):
    def fold(gamma, beta, mean, var):
        scale = gamma / jnp.sqrt(var + eps)
        bias = beta - mean * scale
        return scale.astype(jnp.float32), bias.astype(jnp.float32)

    s1, c1 = fold(*bn1)
    s2, c2 = fold(*bn2)
    s3, c3 = fold(*bn3)

    # 1x1 convs -> (Cin, Cout) matmuls with BN scale folded into out-columns.
    w1 = jnp.transpose(w1_t[:, :, 0, 0], (1, 0)) * s1[None, :]        # (C, P)
    w3 = jnp.transpose(w3_t[:, :, 0, 0], (1, 0)) * s3[None, :]        # (P, 4P)
    # 3x3 conv (O,I,kh,kw) -> (kh, kw, Cin, Cout), BN-scaled.
    w2 = jnp.transpose(w2_t, (2, 3, 1, 0)) * s2[None, None, None, :]  # (3,3,P,P)

    eye_w = jnp.eye(W, dtype=jnp.float32)
    w1_bd = jnp.kron(eye_w, w1).astype(dtype)                         # (W*C, W*P)
    w3_bd = jnp.kron(eye_w, w3).astype(dtype)                         # (W*P, W*C)
    # Banded matrix per vertical tap dy: output width w contracts against input
    # widths w-1, w, w+1 (clipped at the borders == horizontal zero padding).
    w2_band = jnp.stack([
        sum(jnp.kron(jnp.eye(W, W, k=1 - dx, dtype=jnp.float32), w2[dy, dx])
            for dx in range(3))
        for dy in range(3)], axis=0).astype(dtype)                    # (3,W*P,W*P)

    b1_row = jnp.tile(c1, W)[None, :].astype(jnp.float32)             # (1, W*P)
    b2_row = jnp.tile(c2, W)[None, :].astype(jnp.float32)             # (1, W*P)
    b3_row = jnp.tile(c3, W)[None, :].astype(jnp.float32)             # (1, W*C)
    return w1_bd, b1_row, w2_band, b2_row, w3_bd, b3_row


# ----------------------------------------------------------------------------
# Pure-JAX reference (XLA convs + explicit BN) for the correctness check.
# ----------------------------------------------------------------------------
def reference_forward(x, w1_t, bn1, w2_t, bn2, w3_t, bn3, eps=1e-5):
    def bn(y, p):
        g, b, m, v = p
        g, b, m, v = (a[None, :, None, None] for a in (g, b, m, v))
        return (y - m) / jnp.sqrt(v + eps) * g + b

    def conv(y, w, pad):
        return jax.lax.conv_general_dilated(
            y, w, (1, 1), pad, dimension_numbers=("NCHW", "OIHW", "NCHW"))

    out = jax.nn.relu(bn(conv(x, w1_t, "VALID"), bn1))
    out = jax.nn.relu(bn(conv(out, w2_t, "SAME"), bn2))
    out = bn(conv(out, w3_t, "VALID"), bn3)
    return jax.nn.relu(out + x)


if __name__ == "__main__":
    # Small deterministic shapes: planes=8, inplanes=planes*4=32 (residual add
    # requires inplanes == planes * expansion when downsample is None).
    N, H, W = 2, 16, 16
    planes = 8
    inplanes = planes * 4

    key = jax.random.PRNGKey(0)
    ks = jax.random.split(key, 16)

    x = jax.random.normal(ks[0], (N, inplanes, H, W), jnp.float32)

    # Conv weights in PyTorch (O, I, kH, kW) layout, deterministic init.
    w1_t = 0.1 * jax.random.normal(ks[1], (planes, inplanes, 1, 1), jnp.float32)
    w2_t = 0.1 * jax.random.normal(ks[2], (planes, planes, 3, 3), jnp.float32)
    w3_t = 0.1 * jax.random.normal(ks[3], (planes * 4, planes, 1, 1), jnp.float32)

    # BatchNorm parameters (eval mode: "running" stats).
    def bn_params(kg, kb, km, kv, c):
        gamma = 1.0 + 0.1 * jax.random.normal(kg, (c,), jnp.float32)
        beta = 0.1 * jax.random.normal(kb, (c,), jnp.float32)
        mean = 0.1 * jax.random.normal(km, (c,), jnp.float32)
        var = 0.5 + jax.random.uniform(kv, (c,), jnp.float32)
        return gamma, beta, mean, var

    bn1 = bn_params(ks[4], ks[5], ks[6], ks[7], planes)
    bn2 = bn_params(ks[8], ks[9], ks[10], ks[11], planes)
    bn3 = bn_params(ks[12], ks[13], ks[14], ks[15], planes * 4)

    # One-time fold of BN + spatial structure into bf16 kernel weights.
    params = fold_bn_into_weights(w1_t, bn1, w2_t, bn2, w3_t, bn3, W)

    # bf16 activations at the kernel boundary (in a real network: cast once).
    x_bf = x.astype(jnp.bfloat16)

    fwd = jax.jit(bottleneck_forward_nchw)
    out = jax.block_until_ready(fwd(x_bf, *params))

    # Reference gets the same bf16-quantized input (f32 math, un-folded BN), so
    # the remaining diff is only the kernel's bf16 weight/activation rounding.
    ref = jax.block_until_ready(
        reference_forward(x_bf.astype(jnp.float32),
                          w1_t, bn1, w2_t, bn2, w3_t, bn3))

    assert out.shape == (N, inplanes, H, W), out.shape
    max_err = float(jnp.max(jnp.abs(out.astype(jnp.float32) - ref)))
    assert max_err < 5e-2, f"max abs error too large: {max_err}"

    print("KERNEL_OK")
</pallas_src>

<mosaic_0001>
module attributes {stable_mosaic.version = 11 : i64} {
  func.func @bottleneck_kernel(%arg0: i32, %arg1: memref<1x16x512xbf16, #tpu.memory_space<vmem>>, %arg2: memref<512x128xbf16, #tpu.memory_space<vmem>>, %arg3: memref<1x128xf32, #tpu.memory_space<vmem>>, %arg4: memref<3x128x128xbf16, #tpu.memory_space<vmem>>, %arg5: memref<1x128xf32, #tpu.memory_space<vmem>>, %arg6: memref<128x512xbf16, #tpu.memory_space<vmem>>, %arg7: memref<1x512xf32, #tpu.memory_space<vmem>>, %arg8: memref<1x16x512xbf16, #tpu.memory_space<vmem>>, %arg9: memref<18x128xbf16, #tpu.memory_space<vmem>>) attributes {dimension_semantics = [#tpu.dimension_semantics<parallel>], iteration_bounds = array<i64: 2>, scalar_prefetch = 0 : i64, scratch_operands = 1 : i64, tpu.core_type = #tpu.core_type<tc>, window_params = [{transform_indices = @transform_0, window_bounds = array<i64: 1, 16, 512>}, {pipeline_mode = #tpu.pipeline_mode<synchronous>, transform_indices = @transform_1, window_bounds = array<i64: 512, 128>}, {pipeline_mode = #tpu.pipeline_mode<synchronous>, transform_indices = @transform_2, window_bounds = array<i64: 1, 128>}, {pipeline_mode = #tpu.pipeline_mode<synchronous>, transform_indices = @transform_3, window_bounds = array<i64: 3, 128, 128>}, {pipeline_mode = #tpu.pipeline_mode<synchronous>, transform_indices = @transform_4, window_bounds = array<i64: 1, 128>}, {pipeline_mode = #tpu.pipeline_mode<synchronous>, transform_indices = @transform_5, window_bounds = array<i64: 128, 512>}, {pipeline_mode = #tpu.pipeline_mode<synchronous>, transform_indices = @transform_6, window_bounds = array<i64: 1, 512>}, {transform_indices = @transform_7, window_bounds = array<i64: 1, 16, 512>}]} {
    %c0 = arith.constant 0 : index
    %c0_0 = arith.constant 0 : index
    %c0_1 = arith.constant 0 : index
    %0 = vector.load %arg1[%c0, %c0_0, %c0_1] : memref<1x16x512xbf16, #tpu.memory_space<vmem>>, vector<1x16x512xbf16>
    %1 = vector.shape_cast %0 : vector<1x16x512xbf16> to vector<16x512xbf16>
    %c0_2 = arith.constant 0 : index
    %c0_3 = arith.constant 0 : index
    %2 = vector.load %arg2[%c0_2, %c0_3] : memref<512x128xbf16, #tpu.memory_space<vmem>>, vector<512x128xbf16>
    %cst = arith.constant dense<0.000000e+00> : vector<16x128xf32>
    %3 = tpu.matmul %1, %2, %cst {dimension_numbers = #tpu.dot_dimension_numbers<[1], [0], [0], [1], [0, 0, 1, 1], [], []>} : vector<16x512xbf16>, vector<512x128xbf16>, vector<16x128xf32> -> vector<16x128xf32>
    %c0_4 = arith.constant 0 : index
    %c0_5 = arith.constant 0 : index
    %4 = vector.load %arg3[%c0_4, %c0_5] : memref<1x128xf32, #tpu.memory_space<vmem>>, vector<1x128xf32>
    %5 = vector.broadcast %4 : vector<1x128xf32> to vector<16x128xf32>
    %6 = arith.addf %3, %5 : vector<16x128xf32>
    %cst_6 = arith.constant 0.000000e+00 : f32
    %7 = vector.broadcast %cst_6 : f32 to vector<16x128xf32>
    %8 = arith.maximumf %6, %7 : vector<16x128xf32>
    %9 = arith.truncf %8 : vector<16x128xf32> to vector<16x128xbf16>
    %cst_7 = arith.constant 0.000000e+00 : bf16
    %10 = vector.broadcast %cst_7 : bf16 to vector<1x128xbf16>
    %c0_8 = arith.constant 0 : index
    %c0_9 = arith.constant 0 : index
    %11 = vector.load %arg9[%c0_8, %c0_9] : memref<18x128xbf16, #tpu.memory_space<vmem>>, vector<1x128xbf16>
    tpu.vector_store %arg9[%c0_8, %c0_9], %10 {strides = array<i32>} : memref<18x128xbf16, #tpu.memory_space<vmem>>, vector<1x128xbf16>,
    %cst_10 = arith.constant 0.000000e+00 : bf16
    %12 = vector.broadcast %cst_10 : bf16 to vector<1x128xbf16>
    %c17 = arith.constant 17 : index
    %c0_11 = arith.constant 0 : index
    %13 = vector.load %arg9[%c17, %c0_11] : memref<18x128xbf16, #tpu.memory_space<vmem>>, vector<1x128xbf16>
    tpu.vector_store %arg9[%c17, %c0_11], %12 {strides = array<i32>} : memref<18x128xbf16, #tpu.memory_space<vmem>>, vector<1x128xbf16>,
    %c1 = arith.constant 1 : index
    %c0_12 = arith.constant 0 : index
    %14 = vector.load %arg9[%c1, %c0_12] : memref<18x128xbf16, #tpu.memory_space<vmem>>, vector<16x128xbf16>
    tpu.vector_store %arg9[%c1, %c0_12], %9 {strides = array<i32>} : memref<18x128xbf16, #tpu.memory_space<vmem>>, vector<16x128xbf16>,
    %c0_13 = arith.constant 0 : index
    %c0_14 = arith.constant 0 : index
    %15 = vector.load %arg9[%c0_13, %c0_14] : memref<18x128xbf16, #tpu.memory_space<vmem>>, vector<16x128xbf16>
    %c0_15 = arith.constant 0 : index
    %c0_16 = arith.constant 0 : index
    %c0_17 = arith.constant 0 : index
    %16 = vector.load %arg4[%c0_15, %c0_16, %c0_17] : memref<3x128x128xbf16, #tpu.memory_space<vmem>>, vector<1x128x128xbf16>
    %17 = vector.shape_cast %16 : vector<1x128x128xbf16> to vector<128x128xbf16>
    %cst_18 = arith.constant dense<0.000000e+00> : vector<16x128xf32>
    %18 = tpu.matmul %15, %17, %cst_18 {dimension_numbers = #tpu.dot_dimension_numbers<[1], [0], [0], [1], [0, 0, 1, 1], [], []>} : vector<16x128xbf16>, vector<128x128xbf16>, vector<16x128xf32> -> vector<16x128xf32>
    %c1_19 = arith.constant 1 : index
    %c0_20 = arith.constant 0 : index
    %19 = vector.load %arg9[%c1_19, %c0_20] : memref<18x128xbf16, #tpu.memory_space<vmem>>, vector<16x128xbf16>
    %c1_21 = arith.constant 1 : index
    %c0_22 = arith.constant 0 : index
    %c0_23 = arith.constant 0 : index
    %20 = vector.load %arg4[%c1_21, %c0_22, %c0_23] : memref<3x128x128xbf16, #tpu.memory_space<vmem>>, vector<1x128x128xbf16>
    %21 = vector.shape_cast %20 : vector<1x128x128xbf16> to vector<128x128xbf16>
    %cst_24 = arith.constant dense<0.000000e+00> : vector<16x128xf32>
    %22 = tpu.matmul %19, %21, %cst_24 {dimension_numbers = #tpu.dot_dimension_numbers<[1], [0], [0], [1], [0, 0, 1, 1], [], []>} : vector<16x128xbf16>, vector<128x128xbf16>, vector<16x128xf32> -> vector<16x128xf32>
    %23 = arith.addf %18, %22 : vector<16x128xf32>
    %c2 = arith.constant 2 : index
    %c0_25 = arith.constant 0 : index
    %24 = vector.load %arg9[%c2, %c0_25] : memref<18x128xbf16, #tpu.memory_space<vmem>>, vector<16x128xbf16>
    %c2_26 = arith.constant 2 : index
    %c0_27 = arith.constant 0 : index
    %c0_28 = arith.constant 0 : index
    %25 = vector.load %arg4[%c2_26, %c0_27, %c0_28] : memref<3x128x128xbf16, #tpu.memory_space<vmem>>, vector<1x128x128xbf16>
    %26 = vector.shape_cast %25 : vector<1x128x128xbf16> to vector<128x128xbf16>
    %cst_29 = arith.constant dense<0.000000e+00> : vector<16x128xf32>
    %27 = tpu.matmul %24, %26, %cst_29 {dimension_numbers = #tpu.dot_dimension_numbers<[1], [0], [0], [1], [0, 0, 1, 1], [], []>} : vector<16x128xbf16>, vector<128x128xbf16>, vector<16x128xf32> -> vector<16x128xf32>
    %28 = arith.addf %23, %27 : vector<16x128xf32>
    %c0_30 = arith.constant 0 : index
    %c0_31 = arith.constant 0 : index
    %29 = vector.load %arg5[%c0_30, %c0_31] : memref<1x128xf32, #tpu.memory_space<vmem>>, vector<1x128xf32>
    %30 = vector.broadcast %29 : vector<1x128xf32> to vector<16x128xf32>
    %31 = arith.addf %28, %30 : vector<16x128xf32>
    %cst_32 = arith.constant 0.000000e+00 : f32
    %32 = vector.broadcast %cst_32 : f32 to vector<16x128xf32>
    %33 = arith.maximumf %31, %32 : vector<16x128xf32>
    %34 = arith.truncf %33 : vector<16x128xf32> to vector<16x128xbf16>
    %c0_33 = arith.constant 0 : index
    %c0_34 = arith.constant 0 : index
    %35 = vector.load %arg6[%c0_33, %c0_34] : memref<128x512xbf16, #tpu.memory_space<vmem>>, vector<128x512xbf16>
    %cst_35 = arith.constant dense<0.000000e+00> : vector<16x512xf32>
    %36 = tpu.matmul %34, %35, %cst_35 {dimension_numbers = #tpu.dot_dimension_numbers<[1], [0], [0], [1], [0, 0, 1, 1], [], []>} : vector<16x128xbf16>, vector<128x512xbf16>, vector<16x512xf32> -> vector<16x512xf32>
    %c0_36 = arith.constant 0 : index
    %c0_37 = arith.constant 0 : index
    %37 = vector.load %arg7[%c0_36, %c0_37] : memref<1x512xf32, #tpu.memory_space<vmem>>, vector<1x512xf32>
    %38 = vector.broadcast %37 : vector<1x512xf32> to vector<16x512xf32>
    %39 = arith.addf %36, %38 : vector<16x512xf32>
    %40 = arith.extf %1 : vector<16x512xbf16> to vector<16x512xf32>
    %41 = arith.addf %39, %40 : vector<16x512xf32>
    %cst_38 = arith.constant 0.000000e+00 : f32
    %42 = vector.broadcast %cst_38 : f32 to vector<16x512xf32>
    %43 = arith.maximumf %41, %42 : vector<16x512xf32>
    %44 = arith.truncf %43 : vector<16x512xf32> to vector<16x512xbf16>
    %c0_39 = arith.constant 0 : index
    %c0_40 = arith.constant 0 : index
    %c0_41 = arith.constant 0 : index
    %45 = vector.load %arg8[%c0_39, %c0_40, %c0_41] : memref<1x16x512xbf16, #tpu.memory_space<vmem>>, vector<1x16x512xbf16>
    %46 = vector.shape_cast %45 : vector<1x16x512xbf16> to vector<16x512xbf16>
    %47 = vector.shape_cast %44 : vector<16x512xbf16> to vector<1x16x512xbf16>
    tpu.vector_store %arg8[%c0_39, %c0_40, %c0_41], %47 {strides = array<i32>} : memref<1x16x512xbf16, #tpu.memory_space<vmem>>, vector<1x16x512xbf16>,
    return
  }
  func.func @transform_0(%arg0: i32) -> (i32, i32, i32) {
    %c0_i32 = arith.constant 0 : i32
    %c0_i32_0 = arith.constant 0 : i32
    %c0_i32_1 = arith.constant 0 : i32
    return %arg0, %c0_i32, %c0_i32_0 : i32, i32, i32
  }
  func.func @transform_1(%arg0: i32) -> (i32, i32) {
    %c0_i32 = arith.constant 0 : i32
    %c0_i32_0 = arith.constant 0 : i32
    %c0_i32_1 = arith.constant 0 : i32
    return %c0_i32, %c0_i32_0 : i32, i32
  }
  func.func @transform_2(%arg0: i32) -> (i32, i32) {
    %c0_i32 = arith.constant 0 : i32
    %c0_i32_0 = arith.constant 0 : i32
    %c0_i32_1 = arith.constant 0 : i32
    return %c0_i32, %c0_i32_0 : i32, i32
  }
  func.func @transform_3(%arg0: i32) -> (i32, i32, i32) {
    %c0_i32 = arith.constant 0 : i32
    %c0_i32_0 = arith.constant 0 : i32
    %c0_i32_1 = arith.constant 0 : i32
    %c0_i32_2 = arith.constant 0 : i32
    return %c0_i32, %c0_i32_0, %c0_i32_1 : i32, i32, i32
  }
  func.func @transform_4(%arg0: i32) -> (i32, i32) {
    %c0_i32 = arith.constant 0 : i32
    %c0_i32_0 = arith.constant 0 : i32
    %c0_i32_1 = arith.constant 0 : i32
    return %c0_i32, %c0_i32_0 : i32, i32
  }
  func.func @transform_5(%arg0: i32) -> (i32, i32) {
    %c0_i32 = arith.constant 0 : i32
    %c0_i32_0 = arith.constant 0 : i32
    %c0_i32_1 = arith.constant 0 : i32
    return %c0_i32, %c0_i32_0 : i32, i32
  }
  func.func @transform_6(%arg0: i32) -> (i32, i32) {
    %c0_i32 = arith.constant 0 : i32
    %c0_i32_0 = arith.constant 0 : i32
    %c0_i32_1 = arith.constant 0 : i32
    return %c0_i32, %c0_i32_0 : i32, i32
  }
  func.func @transform_7(%arg0: i32) -> (i32, i32, i32) {
    %c0_i32 = arith.constant 0 : i32
    %c0_i32_0 = arith.constant 0 : i32
    %c0_i32_1 = arith.constant 0 : i32
    return %arg0, %c0_i32, %c0_i32_0 : i32, i32, i32
  }
}

</mosaic_0001>

<bundles_post_ra>
// kernel: bottleneck_forward_nchw.1
= control target key start
LH: loop header
LB: loop body
LE: loop exit
PB: predicated region body
PF: predicated region fallthrough
CT: control target
= control target key end

     0   :  { %12 = vsyncpa [#allocation4], 0  ;;  %s2180_s0 = inlined_call_operand.vmem [shape: bf16[2,16,512], index: 0, kind: input, shape index: {}]   ;;  %s2181_s1 = inlined_call_operand.vmem [shape: bf16[512,128], index: 1, kind: input, shape index: {}]   ;;  %s2182_s2 = inlined_call_operand.vmem [shape: f32[1,128], index: 2, kind: input, shape index: {}]   ;;  %s2183_s3 = inlined_call_operand.hbm [shape: bf16[3,128,128], index: 3, kind: input, shape index: {}]   ;;  %s2184_s4 = inlined_call_operand.vmem [shape: f32[1,128], index: 4, kind: input, shape index: {}]   ;;  %s2185_s5 = inlined_call_operand.hbm [shape: bf16[128,512], index: 5, kind: input, shape index: {}]   ;;  %s2186_s6 = inlined_call_operand.vmem [shape: f32[1,512], index: 6, kind: input, shape index: {}]   ;;  %s2187_s7 = inlined_call_operand.vmem [shape: bf16[2,16,512], index: 7, kind: output, shape index: {}]  }
   0x1   :  { %13 = vsyncpa [#allocation6], 0  ;;  %s1990_s24 = smov 0  }
   0x2 LB: > { %s219_s27 = sshll.u32 %s2183_s3, 4  ;;  %s1999_s28 = sadd.s32 4294967295, %s1942_s24   ;;  %s1942_s24 = sphi %s1990_s24, %s19_s24   ;;  %s220_s27 = int_to_ptr.hbm [resolvable:$true] %s219_s27 }
   0x3   : > { %p1351_p0 = scmp.ge.s32.totalorder %s1942_s24, 1  ;;  %p202_p1 = scmp.lt.s32.totalorder %s1942_s24, 3 }
   0x4   : > { %p1848_p2 = scmp.eq.s32.totalorder %s1999_s28, 0  ;;  %s1944_s30 = smov [#allocation3]  }
   0x5   : > { %p2004_p3 = pnand %p1351_p0, %p202_p1  ;;  %s221_s8 = sshll.u32 %s1944_s30, 4  ;;  %s222_s8 = int_to_ptr.vmem [resolvable:$true] %s221_s8 }
   0x6   : > { %s236_s11 = sshll.u32 %s2185_s5, 4  ;;  %s1945_s12 = smov [#allocation5]   ;;  %s237_s11 = int_to_ptr.hbm [resolvable:$true] %s236_s11 }
   0x7   : > { %p1841_p4 = pneg %p2004_p3  ;;  %s238_s13 = sshll.u32 %s1945_s12, 4  ;;  %s239_s13 = int_to_ptr.vmem [resolvable:$true] %s238_s13 }
   0x8   : > { %s1946_s14 = smov 64   ;;  %s1947_s15 = smov 4  }
   0x9   : > { %p1842_p5 = pnand %p1848_p2, %p1841_p4  ;;  %s1948_s16 = smov 256  }
   0xa   : > { %s1949_s17 = smov 16   ;;  %265 = sbr.rel (%p2004_p3) target bundleno = 521 (0x209), region = 48 }
   0xb   : > { %1844 = dma.hbm_to_vmem [thread:$0]  (!%p1842_p5), %s220_s27, 3072, %s222_s8, [#allocation4], %s1946_s14, %s1946_s14, %s1947_s15  }
   0xc   : > { %1847 = dma.hbm_to_vmem [thread:$0]  (!%p1842_p5), %s237_s11, 4096, %s239_s13, [#allocation6], %s1948_s16, %s1948_s16, %s1949_s17  }
   0xf   : > { %1933 = dma.done.wait (%p1848_p2), [#allocation4], 3072  }
  0x10   : > { %1935 = vsyncadd (%p1848_p2), [#allocation4], 4294964224 }
  0x11   : > { %1937 = dma.done.wait (%p1848_p2), [#allocation6], 4096  }
  0x12   : > { %1939 = vsyncadd (%p1848_p2), [#allocation6], 4294963200  ;;  %v1745_v0 = vld [vmem:[%s2181_s1 + $0x38] sm:$0xff]  ;;  %v1744_v4 = vld [vmem:[%s2181_s1 + $0x30] sm:$0xff]  ;;  %p303_p6 = scmp.lt.s32.totalorder %s1999_s28, 1  ;;  %vm658_vm0 = vcmask 1040384  }
  0x13   : > { %v1753_v1 = vld [vmem:[%s2181_s1 + $0x78] sm:$0xff]  ;;  %598 = vmatpush.bf16.msra.mxu0 %v1745_v0  ;;  %v1752_v5 = vld [vmem:[%s2181_s1 + $0x70] sm:$0xff]  ;;  %v1743_v8 = vld [vmem:[%s2181_s1 + $0x28] sm:$0xff]  ;;  %vm659_vm1 = vsmask.f32 256  ;;  %vm691_vm5 = vcmask 1043456  }
  0x14   : > { %v1761_v2 = vld [vmem:[%s2181_s1 + $0xb8] sm:$0xff]  ;;  %612 = vmatpush.bf16.msra.mxu1 %v1753_v1  ;;  %v1760_v6 = vld [vmem:[%s2181_s1 + $0xb0] sm:$0xff]  ;;  %v1751_v9 = vld [vmem:[%s2181_s1 + $0x68] sm:$0xff]  ;;  %s2194_s28 = smov (!%p303_p6, %s1999_s28), 1  ;;  %vm664_vm3 = vsmask.f32 7938 }
  0x15   : > { %v1769_v3 = vld [vmem:[%s2181_s1 + $0xf8] sm:$0xff]  ;;  %626 = vmatpush.bf16.msra.mxu2 %v1761_v2  ;;  %v1768_v7 = vld [vmem:[%s2181_s1 + $0xf0] sm:$0xff]  ;;  %v1759_v10 = vld [vmem:[%s2181_s1 + $0xa8] sm:$0xff]  ;;  %s1732_s25 = sshll.u32 %s2194_s28, 5  ;;  %vm669_vm7 = vsmask.f32 4368 }
  0x16   : > { %640 = vmatpush.bf16.msra.mxu3 %v1769_v3  ;;  %v1767_v11 = vld [vmem:[%s2181_s1 + $0xe8] sm:$0xff]  ;;  %v1742_v12 = vld [vmem:[%s2181_s1 + $0x20] sm:$0xff]  ;;  %v1741_v16 = vld [vmem:[%s2181_s1 + $0x18] sm:$0xff]  ;;  %s2113_s10 = scalar_lea.vmem %s2180_s0, %s1732_s25  ;;  %vm904_vm9 = vcmask 1046528   ;;  %vm744_vm10 = vsmask.f32 7424  ;;  %s312_s12 = scalar_lea.vmem %s2187_s7, %s1732_s25 }
  0x17   : > { %599 = vmatpush.bf16.msra.mxu0 %v1744_v4  ;;  %v1750_v13 = vld [vmem:[%s2181_s1 + $0x60] sm:$0xff]  ;;  %v1749_v17 = vld [vmem:[%s2181_s1 + $0x58] sm:$0xff]  ;;  %v1740_v20 = vld [vmem:[%s2181_s1 + $0x10] sm:$0xff] }
  0x18   : > { %613 = vmatpush.bf16.msra.mxu1 %v1752_v5  ;;  %v1758_v14 = vld [vmem:[%s2181_s1 + $0xa0] sm:$0xff]  ;;  %v1757_v18 = vld [vmem:[%s2181_s1 + $0x98] sm:$0xff]  ;;  %v1748_v21 = vld [vmem:[%s2181_s1 + $0x50] sm:$0xff] }
  0x19   : > { %627 = vmatpush.bf16.msra.mxu2 %v1760_v6  ;;  %v1766_v15 = vld [vmem:[%s2181_s1 + $0xe0] sm:$0xff]  ;;  %v1765_v19 = vld [vmem:[%s2181_s1 + $0xd8] sm:$0xff]  ;;  %v1756_v22 = vld [vmem:[%s2181_s1 + $0x90] sm:$0xff] }
  0x1a   : > { %641 = vmatpush.bf16.msra.mxu3 %v1768_v7  ;;  %v1764_v23 = vld [vmem:[%s2181_s1 + $0xd0] sm:$0xff]  ;;  %v1739_v24 = vld [vmem:[%s2181_s1 + $0x8] sm:$0xff]  ;;  %v1738_v28 = vld [vmem:[%s2181_s1] sm:$0xff] }
  0x1b   : > { %600 = vmatpush.bf16.msra.mxu0 %v1743_v8  ;;  %v1747_v25 = vld [vmem:[%s2181_s1 + $0x48] sm:$0xff]  ;;  %v1746_v29 = vld [vmem:[%s2181_s1 + $0x40] sm:$0xff]  ;;  %v1736_v33 = vld [vmem:[%s2113_s10 + $0xc] sm:$0xf0] }
  0x1c   : > { %614 = vmatpush.bf16.msra.mxu1 %v1751_v9  ;;  %v1755_v26 = vld [vmem:[%s2181_s1 + $0x88] sm:$0xff]  ;;  %v1754_v30 = vld [vmem:[%s2181_s1 + $0x80] sm:$0xff]  ;;  %v1366_v35 = vld [vmem:[%s2113_s10 + $0x10] sm:$0xf0] }
  0x1d   : > { %628 = vmatpush.bf16.msra.mxu2 %v1759_v10  ;;  %v1763_v27 = vld [vmem:[%s2181_s1 + $0xc8] sm:$0xff]  ;;  %v1762_v31 = vld [vmem:[%s2181_s1 + $0xc0] sm:$0xff]  ;;  %v1737_v37 = vld [vmem:[%s2113_s10 + $0x14] sm:$0xf0] }
  0x1e   : > { %642 = vmatpush.bf16.msra.mxu3 %v1767_v11  ;;  %v1364_v32 = vld [vmem:[%s2113_s10] sm:$0xf]  ;;  %v1734_v34 = vld [vmem:[%s2113_s10 + $0x4] sm:$0xf]  ;;  %v1372_v36 = vld [vmem:[%s2113_s10 + $0x8] sm:$0xf] }
  0x1f   : > { %601 = vmatpush.bf16.msra.mxu0 %v1742_v12  ;;  %v1735_v38 = vld [vmem:[%s2113_s10 + $0xc] sm:$0xf]  ;;  %v1374_v39 = vld [vmem:[%s2113_s10 + $0x18] sm:$0xf0]  ;;  %v1365_v40 = vor.u32 %v1736_v33, %v1364_v32  ;;  %v1369_v41 = vor.u32 %v1734_v34, %v1366_v35  ;;  %v1373_v42 = vor.u32 %v1737_v37, %v1372_v36  ;;  %v1777_v44 = vld [vmem:[#allocation3 + $0x38] sm:$0xff] }
  0x20   : > { %615 = vmatpush.bf16.msra.mxu1 %v1750_v13  ;;  %v1377_v43 = vor.u32 %v1735_v38, %v1374_v39  ;;  %v1776_v45 = vld [vmem:[#allocation3 + $0x30] sm:$0xff]  ;;  %vm2142_vm2 = vmand %vm658_vm0, %vm659_vm1  ;;  %v666_v49 = vld [vmem:[#allocation2 + $0x8] sm:$0x1] }
  0x21   : > { %629 = vmatpush.bf16.msra.mxu2 %v1758_v14  ;;  %v661_v47 = vld [vmem:[#allocation2] sm:$0x1]  ;;  %vm665_vm4 = vmand %vm658_vm0, %vm664_vm3  ;;  %v1793_v50 = vld [vmem:[#allocation3 + $0xb8] sm:$0xff] }
  0x22   : > { %643 = vmatpush.bf16.msra.mxu3 %v1766_v15  ;;  %v662_v48 = vsel %vm2142_vm2, 0, %v661_v47  ;;  %v1775_v51 = vld [vmem:[#allocation3 + $0x28] sm:$0xff]  ;;  %v667_v52 = vsel %vm665_vm4, 0, %v666_v49  ;;  %v1785_v53 = vld [vmem:[#allocation3 + $0x78] sm:$0xff]  ;;  %v1792_v54 = vld [vmem:[#allocation3 + $0xb0] sm:$0xff] }
  0x23   : > { %602 = vmatpush.bf16.msra.mxu0 %v1741_v16  ;;  %663 = vst [vmem:[#allocation2] sm:$0x1] %v662_v48  ;;  %v1774_v55 = vld [vmem:[#allocation3 + $0x20] sm:$0xff]  ;;  %v1784_v56 = vld [vmem:[#allocation3 + $0x70] sm:$0xff]  ;;  %v1791_v57 = vld [vmem:[#allocation3 + $0xa8] sm:$0xff] }
  0x24   : > { %616 = vmatpush.bf16.msra.mxu1 %v1749_v17  ;;  %668 = vst [vmem:[#allocation2 + $0x8] sm:$0x1] %v667_v52  ;;  %v1773_v58 = vld [vmem:[#allocation3 + $0x18] sm:$0xff]  ;;  %v1783_v59 = vld [vmem:[#allocation3 + $0x68] sm:$0xff]  ;;  %v1790_v60 = vld [vmem:[#allocation3 + $0xa0] sm:$0xff] }
  0x25   : > { %630 = vmatpush.bf16.msra.mxu2 %v1757_v18  ;;  %v1772_v61 = vld [vmem:[#allocation3 + $0x10] sm:$0xff]  ;;  %v1782_v62 = vld [vmem:[#allocation3 + $0x60] sm:$0xff]  ;;  %v1789_v0 = vld [vmem:[#allocation3 + $0x98] sm:$0xff] }
  0x26   : > { %644 = vmatpush.bf16.msra.mxu3 %v1765_v19  ;;  %v1866_v63 = vld [vmem:[%s2182_s2] ss:$0 sm:$0xff]  ;;  %v1771_v1 = vld [vmem:[#allocation3 + $0x8] sm:$0xff]  ;;  %v1781_v3 = vld [vmem:[#allocation3 + $0x58] sm:$0xff] }
  0x27   : > { %603 = vmatpush.bf16.msra.mxu0 %v1740_v20  ;;  %v1788_v5 = vld [vmem:[#allocation3 + $0x90] sm:$0xff]  ;;  %v1770_v6 = vld [vmem:[#allocation3] sm:$0xff]  ;;  %v1787_v10 = vld [vmem:[#allocation3 + $0x88] sm:$0xff] }
  0x28   : > { %617 = vmatpush.bf16.msra.mxu1 %v1748_v21  ;;  %v1780_v7 = vld [vmem:[#allocation3 + $0x50] sm:$0xff]  ;;  %v1779_v15 = vld [vmem:[#allocation3 + $0x48] sm:$0xff]  ;;  %v1786_v18 = vld [vmem:[#allocation3 + $0x80] sm:$0xff] }
  0x29   : > { %631 = vmatpush.bf16.msra.mxu2 %v1756_v22  ;;  %v1778_v19 = vld [vmem:[#allocation3 + $0x40] sm:$0xff]  ;;  %vm2153_vm6 = vmand %vm691_vm5, %vm664_vm3  ;;  %v1718_v37 = vld [vmem:[#allocation5 + $0xf0] sm:$0xf0] }
  0x2a   : > { %645 = vmatpush.bf16.msra.mxu3 %v1764_v23  ;;  %v1724_v38 = vld [vmem:[#allocation5 + $0xe8] sm:$0xf]  ;;  %vm670_vm8 = vmor %vm659_vm1, %vm669_vm7 }
  0x2b   : > { %604 = vmatpush.bf16.msra.mxu0 %v1739_v24 }
  0x2c   : > { %618 = vmatpush.bf16.msra.mxu1 %v1747_v25 }
  0x2d   : > { %632 = vmatpush.bf16.msra.mxu2 %v1755_v26 }
  0x2e   : > { %646 = vmatpush.bf16.msra.mxu3 %v1763_v27  ;;  %v693_v27 = vld [vmem:[#allocation2] sm:$0xf] }
  0x2f   : > { %605 = vmatpush.bf16.msra.mxu0 %v1738_v28 }
  0x30   : > { %619 = vmatpush.bf16.msra.mxu1 %v1746_v29  ;;  %v1716_v29 = vld [vmem:[#allocation5 + $0xe0] sm:$0xf] }
  0x31   : > { %633 = vmatpush.bf16.msra.mxu2 %v1754_v30  ;;  %v1824_v30 = vld [vmem:[#allocation5 + $0xec] sm:$0xf0] }
  0x32   : > { %647 = vmatpush.bf16.msra.mxu3 %v1762_v31  ;;  %606 = vmatmul.bf16.vlgmr.msra.gmra.mxu0 %v1365_v40  ;;  %v1822_v31 = vld [vmem:[#allocation5 + $0xe4] sm:$0xf]  ;;  %v1717_v36 = vor.u32 %v1824_v30, %v1716_v29  ;;  %v1825_v40 = vld [vmem:[#allocation5 + $0xf4] sm:$0xf0]  ;;  %v1692_v29 = vld [vmem:[#allocation5 + $0xa8] sm:$0xf] }
  0x33   : > { %620 = vmatmul.bf16.vlgmr.msra.gmra.mxu1 %v1369_v41  ;;  %806 = vmatpush.bf16.msrb.mxu0 %v1785_v53  ;;  %v1721_v39 = vor.u32 %v1822_v31, %v1718_v37  ;;  %v1823_v41 = vld [vmem:[#allocation5 + $0xec] sm:$0xf]  ;;  %v697_v53 = vld [vmem:[#allocation2 + $0x8] sm:$0x1]  ;;  %v1817_v30 = vld [vmem:[#allocation5 + $0xb4] sm:$0xf0] }
  0x34   : > { %634 = vmatmul.bf16.vlgmr.msra.gmra.mxu2 %v1373_v42  ;;  %869 = vmatpush.bf16.msrb.mxu1 %v1777_v44  ;;  %v1726_v42 = vld [vmem:[#allocation5 + $0xf8] sm:$0xf0]  ;;  %v1815_v31 = vld [vmem:[#allocation5 + $0xac] sm:$0xf]  ;;  %v1810_v37 = vld [vmem:[#allocation5 + $0x84] sm:$0xf] }
  0x35   : > { %648 = vmatmul.bf16.vlgmr.msra.gmra.mxu3 %v1377_v43  ;;  %957 = vmatpush.bf16.msrb.mxu2 %v1793_v50  ;;  %v1729_v47 = vor.u32 %v1823_v41, %v1726_v42  ;;  %v1813_v41 = vld [vmem:[#allocation5 + $0x94] sm:$0xf0] }
  0x36   : > { %1184 = vmatpush.bf16.msrb.mxu3 %v1717_v36  ;;  %v1812_v36 = vld [vmem:[#allocation5 + $0x8c] sm:$0xf0] }
  0x37   : > { %807 = vmatpush.bf16.msrb.mxu0 %v1784_v56 }
  0x38   : > { %870 = vmatpush.bf16.msrb.mxu1 %v1776_v45  ;;  %v1725_v45 = vor.u32 %v1825_v40, %v1724_v38  ;;  %v1676_v40 = vld [vmem:[#allocation5 + $0x88] sm:$0xf] }
  0x39   : > { %958 = vmatpush.bf16.msrb.mxu2 %v1792_v54 }
  0x3b   : > { %808 = vmatpush.bf16.msrb.mxu0 %v1783_v59 }
  0x3c   : > { %871 = vmatpush.bf16.msrb.mxu1 %v1775_v51 }
  0x3d   : > { %959 = vmatpush.bf16.msrb.mxu2 %v1791_v57 }
  0x3f   : > { %809 = vmatpush.bf16.msrb.mxu0 %v1782_v62 }
  0x40   : > { %872 = vmatpush.bf16.msrb.mxu1 %v1774_v55 }
  0x41   : > { %960 = vmatpush.bf16.msrb.mxu2 %v1790_v60 }
  0x43   : > { %810 = vmatpush.bf16.msrb.mxu0 %v1781_v3 }
  0x44   : > { %873 = vmatpush.bf16.msrb.mxu1 %v1773_v58 }
  0x45   : > { %961 = vmatpush.bf16.msrb.mxu2 %v1789_v0 }
  0x47   : > { %811 = vmatpush.bf16.msrb.mxu0 %v1780_v7 }
  0x48   : > { %874 = vmatpush.bf16.msrb.mxu1 %v1772_v61 }
  0x49   : > { %962 = vmatpush.bf16.msrb.mxu2 %v1788_v5 }
  0x4b   : > { %812 = vmatpush.bf16.msrb.mxu0 %v1779_v15  ;;  %v1702_v15 = vld [vmem:[#allocation5 + $0xd0] sm:$0xf0] }
  0x4c   : > { %875 = vmatpush.bf16.msrb.mxu1 %v1771_v1 }
  0x4d   : > { %963 = vmatpush.bf16.msrb.mxu2 %v1787_v10 }
  0x4f   : > { %813 = vmatpush.bf16.msrb.mxu0 %v1778_v19 }
  0x50   : > { %876 = vmatpush.bf16.msrb.mxu1 %v1770_v6 }
  0x51   : > { %964 = vmatpush.bf16.msrb.mxu2 %v1786_v18 }
  0x53   : > { %1198 = vmatpush.bf16.msra.mxu0 %v1721_v39  ;;  %v1670_v39 = vld [vmem:[#allocation5 + $0x90] sm:$0xf0] }
  0x54   : > { %1212 = vmatpush.bf16.msra.mxu1 %v1725_v45  ;;  %v1673_v42 = vor.u32 %v1810_v37, %v1670_v39  ;;  %v1678_v45 = vld [vmem:[#allocation5 + $0x98] sm:$0xf0]  ;;  %v1867_v37 = vld [vmem:[%s2184_s4] ss:$0 sm:$0xff] }
  0x55   : > { %1226 = vmatpush.bf16.msra.mxu2 %v1729_v47 }
  0xaf   : > { %v607_v2 = vpop.f32.mrf.mxu0 }
  0xb0   : > { %v608_v4 = vadd.f32 %v1866_v63, %v607_v2  ;;  %v621_v8 = vpop.f32.mrf.mxu1 }
  0xb2   : > { %v622_v9 = vadd.f32 %v621_v8, %v608_v4 }
  0xb7   : > { %v635_v11 = vpop.f32.mrf.mxu2  ;;  %v609_v14 = vpop.f32.mrf.mxu0 }
  0xb8   : > { %v649_v12 = vpop.f32.mrf.mxu3  ;;  %v636_v13 = vadd.f32 %v635_v11, %v622_v9  ;;  %v610_v17 = vadd.f32 %v1866_v63, %v609_v14  ;;  %v623_v21 = vpop.f32.mrf.mxu1  ;;  %v1700_v11 = vld [vmem:[#allocation5 + $0xc0] sm:$0xf] }
  0xba   : > { %v650_v16 = vadd.f32 %v649_v12, %v636_v13  ;;  %v624_v23 = vadd.f32 %v623_v21, %v610_v17  ;;  %v1820_v12 = vld [vmem:[#allocation5 + $0xcc] sm:$0xf0]  ;;  %v1818_v13 = vld [vmem:[#allocation5 + $0xc4] sm:$0xf]  ;;  %v1821_v17 = vld [vmem:[#allocation5 + $0xd4] sm:$0xf0] }
  0xbb   : > { %v1701_v14 = vor.u32 %v1820_v12, %v1700_v11  ;;  %v1705_v18 = vor.u32 %v1818_v13, %v1702_v15  ;;  %v1710_v21 = vld [vmem:[#allocation5 + $0xd8] sm:$0xf0]  ;;  %v1622_v11 = vld [vmem:[#allocation5 + $0x30] sm:$0xf0]  ;;  %v1628_v12 = vld [vmem:[#allocation5 + $0x28] sm:$0xf] }
  0xbc   : > { %v654_v20 = vmax.f32 %v650_v16, 0.0  ;;  %v1708_v16 = vld [vmem:[#allocation5 + $0xc8] sm:$0xf]  ;;  %v1801_v13 = vld [vmem:[#allocation5 + $0x34] sm:$0xf0] }
  0xbd   : > { %v1709_v19 = vor.u32 %v1821_v17, %v1708_v16  ;;  %1185 = vmatpush.bf16.msrb.mxu3 %v1701_v14  ;;  %1199 = vmatpush.bf16.msra.mxu0 %v1705_v18  ;;  %v1629_v15 = vor.u32 %v1801_v13, %v1628_v12  ;;  %v1799_v16 = vld [vmem:[#allocation5 + $0x2c] sm:$0xf]  ;;  %v1630_v17 = vld [vmem:[#allocation5 + $0x38] sm:$0xf0] }
  0xbe   : > { %v656_v22 = vpack.c.bf16 %v654_v20, %v654_v20  ;;  %v1819_v20 = vld [vmem:[#allocation5 + $0xcc] sm:$0xf]  ;;  %v1633_v18 = vor.u32 %v1799_v16, %v1630_v17 }
  0xbf   : > { %v637_v24 = vpop.f32.mrf.mxu2  ;;  %1213 = vmatpush.bf16.msra.mxu1 %v1709_v19  ;;  %v1604_v19 = vld [vmem:[#allocation5] sm:$0xf] }
  0xc0   : > { %v672_v25 = vshrl.u32 %v656_v22, 16  ;;  %v638_v26 = vadd.f32 %v637_v24, %v624_v23  ;;  %v651_v28 = vpop.f32.mrf.mxu3  ;;  %v675_v33 = vshll.u32 %v656_v22, 16  ;;  %v1684_v22 = vld [vmem:[#allocation5 + $0xa0] sm:$0xf]  ;;  %v1713_v23 = vor.u32 %v1819_v20, %v1710_v21  ;;  %v1816_v24 = vld [vmem:[#allocation5 + $0xac] sm:$0xf0] }
  0xc1   : > { %v1796_v20 = vld [vmem:[#allocation5 + $0xc] sm:$0xf0]  ;;  %v1794_v21 = vld [vmem:[#allocation5 + $0x4] sm:$0xf] }
  0xc2   : > { %v674_v32 = vrot.slane %v672_v25, 7  ;;  %v652_v35 = vadd.f32 %v651_v28, %v638_v26  ;;  %v1814_v25 = vld [vmem:[#allocation5 + $0xa4] sm:$0xf]  ;;  %v1686_v26 = vld [vmem:[#allocation5 + $0xb0] sm:$0xf0]  ;;  %1227 = vmatpush.bf16.msra.mxu2 %v1713_v23 }
  0xc3   : > { %v1689_v28 = vor.u32 %v1814_v25, %v1686_v26  ;;  %v1606_v23 = vld [vmem:[#allocation5 + $0x10] sm:$0xf0]  ;;  %v1797_v25 = vld [vmem:[#allocation5 + $0x14] sm:$0xf0] }
  0xc4   : > { %v677_v43 = vor.u32 %v675_v33, %v674_v32  ;;  %v655_v44 = vmax.f32 %v652_v35, 0.0  ;;  %v678_v54 = vrot.slane %v674_v32, 4  ;;  %v1693_v32 = vor.u32 %v1817_v30, %v1692_v29  ;;  %v1694_v33 = vld [vmem:[#allocation5 + $0xb8] sm:$0xf0]  ;;  %v1668_v35 = vld [vmem:[#allocation5 + $0x80] sm:$0xf] }
  0xc5   : > { %v1697_v34 = vor.u32 %v1815_v31, %v1694_v33  ;;  %1200 = vmatpush.bf16.msra.mxu0 %v1689_v28  ;;  %v1669_v38 = vor.u32 %v1812_v36, %v1668_v35  ;;  %v1609_v26 = vor.u32 %v1794_v21, %v1606_v23  ;;  %v1795_v28 = vld [vmem:[#allocation5 + $0xc] sm:$0xf]  ;;  %v1614_v29 = vld [vmem:[#allocation5 + $0x18] sm:$0xf0] }
  0xc6   : > { %v694_v48 = vsel %vm2153_vm6, %v677_v43, %v693_v27  ;;  %v657_v49 = vpack.c.bf16 %v655_v44, %v655_v44  ;;  %v1685_v27 = vor.u32 %v1816_v24, %v1684_v22  ;;  %1214 = vmatpush.bf16.msra.mxu1 %v1693_v32  ;;  %v1677_v43 = vor.u32 %v1813_v41, %v1676_v40  ;;  %v1811_v44 = vld [vmem:[#allocation5 + $0x8c] sm:$0xf]  ;;  %v1612_v24 = vld [vmem:[#allocation5 + $0x8] sm:$0xf] }
  0xc7   : > { %695 = vst [vmem:[#allocation2] sm:$0xf] %v694_v48  ;;  %1228 = vmatpush.bf16.msra.mxu2 %v1697_v34  ;;  %v1681_v47 = vor.u32 %v1811_v44, %v1678_v45  ;;  %v1652_v48 = vld [vmem:[#allocation5 + $0x60] sm:$0xf]  ;;  %v1605_v22 = vor.u32 %v1796_v20, %v1604_v19  ;;  %v1617_v30 = vor.u32 %v1795_v28, %v1614_v29 }
  0xc8   : > { %v680_v50 = vshrl.u32 %v657_v49, 16  ;;  %v683_v52 = vshll.u32 %v657_v49, 16  ;;  %1186 = vmatpush.bf16.msrb.mxu3 %v1685_v27  ;;  %v1808_v49 = vld [vmem:[#allocation5 + $0x6c] sm:$0xf0]  ;;  %v1613_v27 = vor.u32 %v1797_v25, %v1612_v24 }
  0xc9   : > { %1201 = vmatpush.bf16.msra.mxu0 %v1673_v42 }
  0xca   : > { %v682_v51 = vrot.slane %v680_v50, 7  ;;  %1215 = vmatpush.bf16.msra.mxu1 %v1677_v43  ;;  %v1806_v50 = vld [vmem:[#allocation5 + $0x64] sm:$0xf] }
  0xcb   : > { %1229 = vmatpush.bf16.msra.mxu2 %v1681_v47 }
  0xcc   : > { %v685_v55 = vor.u32 %v683_v52, %v682_v51  ;;  %v687_v56 = vrot.slane %v682_v51, 4  ;;  %1187 = vmatpush.bf16.msrb.mxu3 %v1669_v38  ;;  %v1653_v51 = vor.u32 %v1808_v49, %v1652_v48  ;;  %v1654_v52 = vld [vmem:[#allocation5 + $0x70] sm:$0xf0] }
  0xcd   : > { %v1014_v48 = vld [vmem:[%s2186_s6] sm:$0xf] }
  0xce   : > { %v686_v57 = vsel %vm670_vm8, %v678_v54, %v685_v55  ;;  %v698_v58 = vsel %vm2142_vm2, %v687_v56, %v697_v53  ;;  %v1831_v63 = vld [vmem:[#allocation2] sm:$0xe]  ;;  %v1660_v53 = vld [vmem:[#allocation5 + $0x68] sm:$0xf]  ;;  %v1809_v54 = vld [vmem:[#allocation5 + $0x74] sm:$0xf0]  ;;  %v1657_v55 = vor.u32 %v1806_v50, %v1654_v52 }
  0xcf   : > { %696 = vst [vmem:[#allocation2 + $0x4] sm:$0xf] %v686_v57  ;;  %v1661_v56 = vor.u32 %v1809_v54, %v1660_v53  ;;  %v1807_v57 = vld [vmem:[#allocation5 + $0x6c] sm:$0xf]  ;;  %v1017_v49 = vperm.slane %v1014_v48, 1  ;;  %v314_v50 = vld [vmem:[%s2113_s10] sm:$0xff] }
  0xd0   : > { %699 = vst [vmem:[#allocation2 + $0x8] sm:$0x1] %v698_v58  ;;  %v1662_v58 = vld [vmem:[#allocation5 + $0x78] sm:$0xf0]  ;;  %1188 = vmatpush.bf16.msrb.mxu3 %v1653_v51  ;;  %1202 = vmatpush.bf16.msra.mxu0 %v1657_v55  ;;  %v1018_v52 = vperm.slane %v1014_v48, 2 }
  0xd1   : > { %1216 = vmatpush.bf16.msra.mxu1 %v1661_v56  ;;  %v315_v53 = vld [vmem:[%s2113_s10 + $0x8] sm:$0xff]  ;;  %v1241_v56 = vunpack.c.h.bf16 %v314_v50 }
  0xd6   : > { %v1827_v59 = vld [vmem:[#allocation2] sm:$0xff]  }
  0xd7   : > { %v1830_v60 = vld [vmem:[#allocation2] sm:$0xf0]  ;;  %v748_v61 = vshll.u32 %v1827_v59, 16  ;;  %877 = vmatmul.bf16.vlgmr.msrb.gmra.mxu1 %v1827_v59  ;;  %v718_v62 = vld [vmem:[#allocation2 + $0x8] sm:$0x1]  ;;  %v746_v4 = vshrl.u32 %v1827_v59, 16  ;;  %v1665_v59 = vor.u32 %v1807_v57, %v1662_v58 }
  0xd8   : > { %v741_v0 = vunpack.c.l.b16 %v718_v62  ;;  %v1832_v1 = vor.u32 %v1831_v63, %v1830_v60  ;;  %v1636_v60 = vld [vmem:[#allocation5 + $0x40] sm:$0xf]  ;;  %v1802_v62 = vld [vmem:[#allocation5 + $0x44] sm:$0xf]  ;;  %v1016_v57 = vperm.slane %v1014_v48, 0 }
  0xd9   : > { %v750_v2 = vrot.slane %v748_v61, 1  ;;  %v1804_v61 = vld [vmem:[#allocation5 + $0x4c] sm:$0xf0]  ;;  %1230 = vmatpush.bf16.msra.mxu2 %v1665_v59  ;;  %v1242_v59 = vunpack.c.l.bf16 %v315_v53 }
  0xda   : > { %v743_v3 = vpack.c.b16 %v741_v0, %v741_v0  ;;  %v905_v5 = vrot.slane %v1832_v1, 1  ;;  %v1637_v63 = vor.u32 %v1804_v61, %v1636_v60  ;;  %v1638_v0 = vld [vmem:[#allocation5 + $0x50] sm:$0xf0]  ;;  %v1644_v1 = vld [vmem:[#allocation5 + $0x48] sm:$0xf]  ;;  %v1019_v60 = vperm.slane %v1014_v48, 3 }
  0xdb   : > { %v751_v46 = vor.u32 %v750_v2, %v746_v4  ;;  %v1805_v2 = vld [vmem:[#allocation5 + $0x54] sm:$0xf0]  ;;  %v1240_v61 = vunpack.c.l.bf16 %v314_v50 }
  0xdc   : > { %v906_v6 = vrot.slane %v743_v3, 1  ;;  %v753_v7 = vshll.u32 %v743_v3, 16  ;;  %v1641_v3 = vor.u32 %v1802_v62, %v1638_v0  ;;  %v1645_v4 = vor.u32 %v1805_v2, %v1644_v1  ;;  %1189 = vmatpush.bf16.msrb.mxu3 %v1637_v63 }
  0xdd   : > { %v1243_v63 = vunpack.c.h.bf16 %v315_v53 }
  0xde   : > { %v907_v8 = vsel %vm904_vm9, %v905_v5, %v906_v6  ;;  %v755_v9 = vrot.slane %v753_v7, 1  ;;  %v1803_v5 = vld [vmem:[#allocation5 + $0x4c] sm:$0xf]  ;;  %v1646_v6 = vld [vmem:[#allocation5 + $0x58] sm:$0xf0]  ;;  %1203 = vmatpush.bf16.msra.mxu0 %v1641_v3  ;;  %1217 = vmatpush.bf16.msra.mxu1 %v1645_v4 }
  0xdf   : > { %965 = vmatmul.bf16.vlgmr.msrb.gmra.mxu2 %v907_v8  ;;  %v1649_v7 = vor.u32 %v1803_v5, %v1646_v6  ;;  %v1800_v8 = vld [vmem:[#allocation5 + $0x2c] sm:$0xf0]  ;;  %v316_v5 = vld [vmem:[%s2113_s10 + $0x10] sm:$0xff] }
  0xe0   : > { %v756_v10 = vsel %vm744_vm10, %v751_v46, %v755_v9  ;;  %v1620_v46 = vld [vmem:[#allocation5 + $0x20] sm:$0xf]  ;;  %v1798_v9 = vld [vmem:[#allocation5 + $0x24] sm:$0xf]  ;;  %v1245_v13 = vunpack.c.h.bf16 %v316_v5  ;;  %v1244_v19 = vunpack.c.l.bf16 %v316_v5 }
  0xe1   : > { %814 = vmatmul.bf16.vlgmr.msrb.gmra.mxu0 %v756_v10  ;;  %1231 = vmatpush.bf16.msra.mxu2 %v1649_v7  ;;  %v1621_v10 = vor.u32 %v1800_v8, %v1620_v46  ;;  %v1625_v14 = vor.u32 %v1798_v9, %v1622_v11  ;;  %v317_v46 = vld [vmem:[%s2113_s10 + $0x18] sm:$0xff] }
  0xe2   : > { %1218 = vmatpush.bf16.msra.mxu1 %v1629_v15  ;;  %v1246_v17 = vunpack.c.l.bf16 %v317_v46 }
  0xe3   : > { %1190 = vmatpush.bf16.msrb.mxu3 %v1621_v10  ;;  %1204 = vmatpush.bf16.msra.mxu0 %v1625_v14 }
  0xe5   : > { %1232 = vmatpush.bf16.msra.mxu2 %v1633_v18 }
  0xe6   : > { %1219 = vmatpush.bf16.msra.mxu1 %v1613_v27 }
  0xe7   : > { %1191 = vmatpush.bf16.msrb.mxu3 %v1605_v22  ;;  %1205 = vmatpush.bf16.msra.mxu0 %v1609_v26  ;;  %v1247_v22 = vunpack.c.h.bf16 %v317_v46 }
  0xe9   : > { %1233 = vmatpush.bf16.msra.mxu2 %v1617_v30 }
 0x154   : > { %v878_v31 = vpop.f32.mrf.mxu1 }
 0x15c   : > { %v880_v38 = vpop.f32.mrf.mxu1 }
 0x15e   : > { %v815_v32 = vpop.f32.mrf.mxu0 }
 0x15f   : > { %v879_v34 = vadd.f32 %v878_v31, %v815_v32 }
 0x162   : > { %v966_v33 = vpop.f32.mrf.mxu2 }
 0x163   : > { %v971_v36 = vadd.f32 %v966_v33, %v879_v34 }
 0x165   : > { %v977_v41 = vadd.f32 %v1867_v37, %v971_v36 }
 0x166   : > { %v817_v35 = vpop.f32.mrf.mxu0 }
 0x167   : > { %v881_v39 = vadd.f32 %v880_v38, %v817_v35  ;;  %v979_v44 = vmax.f32 %v977_v41, 0.0 }
 0x16a   : > { %v968_v40 = vpop.f32.mrf.mxu2 }
 0x16b   : > { %v972_v42 = vadd.f32 %v968_v40, %v881_v39 }
 0x16d   : > { %v978_v43 = vadd.f32 %v1867_v37, %v972_v42 }
 0x16f   : > { %v980_v45 = vmax.f32 %v978_v43, 0.0 }
 0x171   : > { %v981_v47 = vpack.c.bf16 %v980_v45, %v979_v44 }
 0x173   : > { %1192 = vmatmul.bf16.vlgmr.msrb.gmra.mxu3 %v981_v47  ;;  %1206 = vmatmul.bf16.vlgmr.msra.gmra.mxu0 %v981_v47 }
 0x174   : > { %1220 = vmatmul.bf16.vlgmr.msra.gmra.mxu1 %v981_v47  ;;  %1234 = vmatmul.bf16.vlgmr.msra.gmra.mxu2 %v981_v47 }
 0x1f0   : > { %v1207_v51 = vpop.f32.mrf.mxu0 }
 0x1f1   : > { %v1221_v54 = vpop.f32.mrf.mxu1  ;;  %v1208_v55 = vadd.f32 %v1207_v51, %v1017_v49 }
 0x1f2   : > { %v1222_v58 = vadd.f32 %v1221_v54, %v1018_v52 }
 0x1f3   : > { %v1249_v0 = vadd.f32 %v1241_v56, %v1208_v55 }
 0x1f4   : > { %v1250_v3 = vadd.f32 %v1242_v59, %v1222_v58 }
 0x1f5   : > { %v1257_v10 = vmax.f32 %v1249_v0, 0.0 }
 0x1f6   : > { %v1193_v62 = vpop.f32.mrf.mxu3  ;;  %v1258_v14 = vmax.f32 %v1250_v3, 0.0 }
 0x1f7   : > { %v1194_v1 = vadd.f32 %v1193_v62, %v1016_v57  ;;  %v1235_v2 = vpop.f32.mrf.mxu2 }
 0x1f8   : > { %v1236_v4 = vadd.f32 %v1235_v2, %v1019_v60  ;;  %v1209_v6 = vpop.f32.mrf.mxu0 }
 0x1f9   : > { %v1248_v7 = vadd.f32 %v1240_v61, %v1194_v1  ;;  %v1223_v8 = vpop.f32.mrf.mxu1  ;;  %v1210_v12 = vadd.f32 %v1209_v6, %v1017_v49 }
 0x1fa   : > { %v1251_v9 = vadd.f32 %v1243_v63, %v1236_v4  ;;  %v1224_v16 = vadd.f32 %v1223_v8, %v1018_v52 }
 0x1fb   : > { %v1256_v11 = vmax.f32 %v1248_v7, 0.0  ;;  %v1253_v23 = vadd.f32 %v1245_v13, %v1210_v12 }
 0x1fc   : > { %v1259_v15 = vmax.f32 %v1251_v9, 0.0  ;;  %v1254_v26 = vadd.f32 %v1246_v17, %v1224_v16 }
 0x1fd   : > { %v1264_v18 = vpack.c.bf16 %v1257_v10, %v1256_v11  ;;  %v1261_v30 = vmax.f32 %v1253_v23, 0.0 }
 0x1fe   : > { %v1265_v20 = vpack.c.bf16 %v1259_v15, %v1258_v14  ;;  %v1195_v21 = vpop.f32.mrf.mxu3  ;;  %v1262_v32 = vmax.f32 %v1254_v26, 0.0 }
 0x1ff   : > { %1268 = vst [vmem:[%s312_s12] sm:$0xff] %v1264_v18  ;;  %v1196_v24 = vadd.f32 %v1195_v21, %v1016_v57  ;;  %v1237_v25 = vpop.f32.mrf.mxu2 }
 0x200   : > { %1269 = vst [vmem:[%s312_s12 + $0x8] sm:$0xff] %v1265_v20  ;;  %v1238_v27 = vadd.f32 %v1237_v25, %v1019_v60 }
 0x201   : > { %v1252_v28 = vadd.f32 %v1244_v19, %v1196_v24 }
 0x202   : > { %v1255_v29 = vadd.f32 %v1247_v22, %v1238_v27 }
 0x203   : > { %v1260_v31 = vmax.f32 %v1252_v28, 0.0 }
 0x204   : > { %v1263_v33 = vmax.f32 %v1255_v29, 0.0 }
 0x205   : > { %v1266_v34 = vpack.c.bf16 %v1261_v30, %v1260_v31 }
 0x206   : > { %v1267_v35 = vpack.c.bf16 %v1263_v33, %v1262_v32 }
 0x207   : > { %1270 = vst [vmem:[%s312_s12 + $0x10] sm:$0xff] %v1266_v34 }
 0x208   : > { %1271 = vst [vmem:[%s312_s12 + $0x18] sm:$0xff] %v1267_v35 }
 0x209 PF: > { %s19_s24 = sadd.s32 1, %s1942_s24  }
 0x20a   : > { %p16_p7 = scmp.ge.s32.totalorder %s19_s24, 4  }
 0x20c   :  { %18 = sbr.rel (!%p16_p7) target bundleno = 2 (0x2), region = 89 }
 0x211   :  { %1293 = vsyncpa [#allocation4], 1 }
 0x212   :  { %1295 = vsyncpa [#allocation4 + $0x1], 1 }
 0x213   :  { %1296 = vsyncpa [#allocation6], 1 }

</bundles_post_ra>
